<compile_context>
chip_gen: v7x
topology: tpu7x:2x2x1
jax: 0.10.0
libtpu: 0.0.40
codegen_flags: <defaults>
</compile_context>

<pallas_src>
import jax
import jax.numpy as jnp
from jax import lax
from jax.experimental import pallas as pl
from jax.experimental.pallas import tpu as pltpu


def correlation_kernel(v_ref, q_ref, attenT_ref,
                       wv_ref, bv_ref, wq_ref, bq_ref, wa_ref, ba_ref,
                       out_ref):
    Bb, N_q, N_obj = attenT_ref.shape
    Mp = wv_ref.shape[1]

    # lin_v + ReLU / lin_q + ReLU: stacked 2-D MXU matmuls (inputs already
    # flattened host-side), bf16 operands, f32 accumulation; bias/ReLU in f32.
    vp = jnp.maximum(
        jnp.dot(v_ref[...], wv_ref[...],
                preferred_element_type=jnp.float32) + bv_ref[...], 0.0)
    qp = jnp.maximum(
        jnp.dot(q_ref[...], wq_ref[...],
                preferred_element_type=jnp.float32) + bq_ref[...], 0.0)

    # Lane-dense reshapes (last dim Mp is a multiple of 128 -> layout-free).
    vp3 = vp.reshape(Bb, N_obj, Mp)     # (Bb, N_obj, Mp) f32
    qp3 = qp.reshape(Bb, N_q, Mp)       # (Bb, N_q,  Mp) f32

    # Bilinear form, contracting over the larger N_obj on the MXU (atten was
    # pre-transposed to (Bb, N_q, N_obj) on the host):
    #   u[b,j,m] = sum_i attenT[b,j,i] * vp[b,i,m]   (batched MXU dot, K=N_obj)
    #   h[b,m]   = sum_j u[b,j,m] * qp[b,j,m]        (VPU mul + sublane reduce)
    u = lax.dot_general(attenT_ref[...], vp3,
                        dimension_numbers=(((2,), (1,)), ((0,), (0,))),
                        preferred_element_type=jnp.float32)   # (Bb, N_q, Mp)
    h = jnp.sum(u * qp3, axis=1)                              # (Bb, Mp) f32

    # lin_atten (no activation): f32 (Bb, Mp) @ f32 (Mp, Mp) -> dense f32 store.
    out_ref[...] = (jnp.dot(h, wa_ref[...],
                            preferred_element_type=jnp.float32) + ba_ref[...])


def _pick_block_b(B, N_obj, N_q, Fv, Fq, Mp, budget_bytes=20 << 20):
    """VMEM-budget-derived batch block.

    Per batch element we hold the (double-buffered) bf16 v/q rows, the f32
    transposed-atten tile and the f32 output row, plus single-buffered f32
    intermediates (vp, qp, u, h).  Small B collapses to a single grid step:
    the ~0.35us per-step fixed cost dwarfs the nanoseconds of MXU work here,
    so fewer/larger steps win on every generation.
    """
    per_b = (2 * ((N_obj * Fv + N_q * Fq) * 2        # bf16 v/q rows, 2x buffered
                  + N_obj * N_q * 4                  # f32 attenT tile, 2x buffered
                  + Mp * 4)                          # f32 output row, 2x buffered
             + (N_obj + 2 * N_q + 2) * Mp * 4)       # f32 vp/qp/u/h intermediates
    max_bb = max(1, budget_bytes // per_b)
    if B <= max_bb:
        return B                                     # grid=(1,): whole batch in one step
    # Largest divisor of B that fits the budget; multiple of 8 keeps the
    # (Bb, Mp) output block and the stacked matmul row counts sublane-aligned
    # (and, with N_obj/N_q >= 8, MXU-height friendly on v5e/v6e/v7x).
    best = None
    for cand in range(8, int(max_bb) + 1, 8):
        if B % cand == 0:
            best = cand
    if best is None:
        # No aligned divisor fits the soft budget -- fall back to the whole
        # batch (block == full array keeps every BlockSpec legal).
        return B
    return best


def correlation_forward(v, q, atten, params, *, block_b=None):
    B, N_obj, Fv = v.shape
    _, N_q, Fq = q.shape
    wv, bv, wq, bq, wa, ba = params
    M = wv.shape[1]
    Mp = ((M + 127) // 128) * 128          # pad mid_features to full 128 lanes

    # Layout guard (perf, not correctness): the in-kernel (Bb*N, Mp)->(Bb, N, Mp)
    # reshapes are only relayout-free when N is a multiple of 8.
    assert N_obj % 8 == 0 and N_q % 8 == 0, (N_obj, N_q)

    # Zero-pad mid dim: padded columns stay exactly zero through bias-add,
    # ReLU and the final matmul (zero wa rows/cols, zero ba cols).
    pad_c = lambda x: jnp.pad(x, ((0, 0), (0, Mp - x.shape[1])))
    wv_p = pad_c(wv).astype(jnp.bfloat16)
    wq_p = pad_c(wq).astype(jnp.bfloat16)
    wa_p = jnp.pad(wa, ((0, Mp - M), (0, Mp - M)))       # keep f32 (h stays f32)
    bv_p, bq_p, ba_p = pad_c(bv), pad_c(bq), pad_c(ba)   # biases stay f32

    # Host-side flatten (free: contiguous in HBM) so the DMA lands already in
    # matmul layout; stream v/q as bf16 (halves their DMA bytes).
    v2 = v.reshape(B * N_obj, Fv).astype(jnp.bfloat16)
    q2 = q.reshape(B * N_q, Fq).astype(jnp.bfloat16)
    # Transpose atten so the batched MXU dot contracts over the larger N_obj;
    # atten is tiny, keep it f32 for accuracy.
    atten_t = jnp.swapaxes(atten, 1, 2)                  # (B, N_q, N_obj) f32

    Bb = block_b if block_b is not None else _pick_block_b(B, N_obj, N_q, Fv, Fq, Mp)
    assert B % Bb == 0, (B, Bb)
    grid = (B // Bb,)

    full2d = lambda arr: pl.BlockSpec(arr.shape, lambda b: (0, 0))
    nbytes = lambda x: int(x.size) * x.dtype.itemsize

    flops = 2 * B * Mp * (N_obj * Fv + N_q * Fq + N_q * N_obj + N_q + Mp)
    bytes_accessed = (nbytes(v2) + nbytes(q2) + nbytes(atten_t)
                      + nbytes(wv_p) + nbytes(wq_p) + nbytes(wa_p)
                      + nbytes(bv_p) + nbytes(bq_p) + nbytes(ba_p)
                      + B * Mp * 4)

    # Explicit VMEM bound: double-buffered batch blocks + (double-buffered)
    # constant weight blocks + f32 intermediates + headroom.  Stays well under
    # v7x's 64 MiB physical VMEM for any Bb the budget above can pick.
    weight_bytes = sum(nbytes(w) for w in (wv_p, wq_p, wa_p, bv_p, bq_p, ba_p))
    block_io_bytes = Bb * ((N_obj * Fv + N_q * Fq) * 2 + N_obj * N_q * 4 + Mp * 4)
    interm_bytes = Bb * (N_obj + 2 * N_q + 2) * Mp * 4
    vmem_limit = int(min(48 << 20,
                         max(16 << 20,
                             2 * block_io_bytes + 2 * weight_bytes
                             + interm_bytes + (4 << 20))))

    out = pl.pallas_call(
        correlation_kernel,
        out_shape=jax.ShapeDtypeStruct((B, Mp), jnp.float32),
        grid_spec=pl.GridSpec(
            grid=grid,
            in_specs=[
                pl.BlockSpec((Bb * N_obj, Fv), lambda b: (b, 0)),
                pl.BlockSpec((Bb * N_q, Fq), lambda b: (b, 0)),
                pl.BlockSpec((Bb, N_q, N_obj), lambda b: (b, 0, 0)),
                full2d(wv_p), full2d(bv_p),
                full2d(wq_p), full2d(bq_p),
                full2d(wa_p), full2d(ba_p),
            ],
            out_specs=pl.BlockSpec((Bb, Mp), lambda b: (b, 0)),
        ),
        compiler_params=pltpu.CompilerParams(
            dimension_semantics=("parallel",),
            vmem_limit_bytes=vmem_limit),
        cost_estimate=pl.CostEstimate(flops=flops, transcendentals=0,
                                      bytes_accessed=bytes_accessed),
    )(v2, q2, atten_t, wv_p, bv_p, wq_p, bq_p, wa_p, ba_p)

    # Drop lane padding, restore the module's (B, 1, mid_features) shape.
    return out[:, :M].reshape(B, 1, M)


def make_weightnorm_linear(key, in_size, out_size):
    """Deterministic synthetic init of weight_norm(nn.Linear, dim=None)."""
    kw, kg, kb = jax.random.split(key, 3)
    v_raw = 0.1 * jax.random.normal(kw, (out_size, in_size), jnp.float32)
    g = jnp.float32(1.0) + 0.05 * jax.random.normal(kg, (), jnp.float32)
    b = 0.1 * jax.random.normal(kb, (out_size,), jnp.float32)
    # weight_norm with dim=None: W = g * V / ||V||_F  (scalar g)
    w = g * v_raw / jnp.linalg.norm(v_raw)
    return w.T, b.reshape(1, out_size)  # (in, out), (1, out)


def reference(v, q, atten, params):
    """Pure-f32 reference matching the PyTorch module semantics."""
    wv, bv, wq, bq, wa, ba = params
    vp = jax.nn.relu(v @ wv + bv)                     # (B, N_obj, M)
    qp = jax.nn.relu(q @ wq + bq)                     # (B, N_q, M)
    h = jnp.einsum('bim,bij,bjm->bm', vp, atten, qp)  # (B, M)
    return h[:, None, :] @ wa + ba                    # (B, 1, M)


if __name__ == "__main__":
    B, N_obj, N_q = 16, 16, 8
    Fv, Fq, M = 32, 24, 64   # v_features, q_features, mid_features

    key = jax.random.PRNGKey(0)
    k_v, k_q, k_a, k_lv, k_lq, k_la = jax.random.split(key, 6)

    v = jax.random.normal(k_v, (B, N_obj, Fv), jnp.float32)
    q = jax.random.normal(k_q, (B, N_q, Fq), jnp.float32)
    atten = jax.random.normal(k_a, (B, N_obj, N_q), jnp.float32)

    wv, bv = make_weightnorm_linear(k_lv, Fv, M)
    wq, bq = make_weightnorm_linear(k_lq, Fq, M)
    wa, ba = make_weightnorm_linear(k_la, M, M)
    params = (wv, bv, wq, bq, wa, ba)

    out = correlation_forward(v, q, atten, params)
    out = jax.block_until_ready(out)

    ref = reference(v, q, atten, params)
    assert out.shape == (B, 1, M), out.shape
    err = float(jnp.max(jnp.abs(out - ref)))
    # bf16-streamed v/q and lin_v/lin_q weights (f32 accumulation everywhere).
    assert jnp.allclose(out, ref, atol=2e-3, rtol=2e-3), err

    print("KERNEL_OK")
</pallas_src>

<mosaic_0001>
module attributes {stable_mosaic.version = 11 : i64} {
  func.func @correlation_kernel(%arg0: i32, %arg1: memref<256x32xbf16, #tpu.memory_space<vmem>>, %arg2: memref<128x24xbf16, #tpu.memory_space<vmem>>, %arg3: memref<16x8x16xf32, #tpu.memory_space<vmem>>, %arg4: memref<32x128xbf16, #tpu.memory_space<vmem>>, %arg5: memref<1x128xf32, #tpu.memory_space<vmem>>, %arg6: memref<24x128xbf16, #tpu.memory_space<vmem>>, %arg7: memref<1x128xf32, #tpu.memory_space<vmem>>, %arg8: memref<128x128xf32, #tpu.memory_space<vmem>>, %arg9: memref<1x128xf32, #tpu.memory_space<vmem>>, %arg10: memref<16x128xf32, #tpu.memory_space<vmem>>) attributes {dimension_semantics = [#tpu.dimension_semantics<parallel>], iteration_bounds = array<i64: 1>, scalar_prefetch = 0 : i64, scratch_operands = 0 : i64, tpu.core_type = #tpu.core_type<tc>, window_params = [{transform_indices = @transform_0, window_bounds = array<i64: 256, 32>}, {transform_indices = @transform_1, window_bounds = array<i64: 128, 24>}, {transform_indices = @transform_2, window_bounds = array<i64: 16, 8, 16>}, {pipeline_mode = #tpu.pipeline_mode<synchronous>, transform_indices = @transform_3, window_bounds = array<i64: 32, 128>}, {pipeline_mode = #tpu.pipeline_mode<synchronous>, transform_indices = @transform_4, window_bounds = array<i64: 1, 128>}, {pipeline_mode = #tpu.pipeline_mode<synchronous>, transform_indices = @transform_5, window_bounds = array<i64: 24, 128>}, {pipeline_mode = #tpu.pipeline_mode<synchronous>, transform_indices = @transform_6, window_bounds = array<i64: 1, 128>}, {pipeline_mode = #tpu.pipeline_mode<synchronous>, transform_indices = @transform_7, window_bounds = array<i64: 128, 128>}, {pipeline_mode = #tpu.pipeline_mode<synchronous>, transform_indices = @transform_8, window_bounds = array<i64: 1, 128>}, {transform_indices = @transform_9, window_bounds = array<i64: 16, 128>}]} {
    %c0 = arith.constant 0 : index
    %c0_0 = arith.constant 0 : index
    %0 = vector.load %arg1[%c0, %c0_0] : memref<256x32xbf16, #tpu.memory_space<vmem>>, vector<256x32xbf16>
    %c0_1 = arith.constant 0 : index
    %c0_2 = arith.constant 0 : index
    %1 = vector.load %arg4[%c0_1, %c0_2] : memref<32x128xbf16, #tpu.memory_space<vmem>>, vector<32x128xbf16>
    %cst = arith.constant dense<0.000000e+00> : vector<256x128xf32>
    %2 = tpu.matmul %0, %1, %cst {dimension_numbers = #tpu.dot_dimension_numbers<[1], [0], [0], [1], [0, 0, 1, 1], [], []>} : vector<256x32xbf16>, vector<32x128xbf16>, vector<256x128xf32> -> vector<256x128xf32>
    %c0_3 = arith.constant 0 : index
    %c0_4 = arith.constant 0 : index
    %3 = vector.load %arg5[%c0_3, %c0_4] : memref<1x128xf32, #tpu.memory_space<vmem>>, vector<1x128xf32>
    %4 = vector.broadcast %3 : vector<1x128xf32> to vector<256x128xf32>
    %5 = arith.addf %2, %4 : vector<256x128xf32>
    %cst_5 = arith.constant 0.000000e+00 : f32
    %6 = vector.broadcast %cst_5 : f32 to vector<256x128xf32>
    %7 = arith.maximumf %5, %6 : vector<256x128xf32>
    %c0_6 = arith.constant 0 : index
    %c0_7 = arith.constant 0 : index
    %8 = vector.load %arg2[%c0_6, %c0_7] : memref<128x24xbf16, #tpu.memory_space<vmem>>, vector<128x24xbf16>
    %c0_8 = arith.constant 0 : index
    %c0_9 = arith.constant 0 : index
    %9 = vector.load %arg6[%c0_8, %c0_9] : memref<24x128xbf16, #tpu.memory_space<vmem>>, vector<24x128xbf16>
    %cst_10 = arith.constant dense<0.000000e+00> : vector<128x128xf32>
    %10 = tpu.matmul %8, %9, %cst_10 {dimension_numbers = #tpu.dot_dimension_numbers<[1], [0], [0], [1], [0, 0, 1, 1], [], []>} : vector<128x24xbf16>, vector<24x128xbf16>, vector<128x128xf32> -> vector<128x128xf32>
    %c0_11 = arith.constant 0 : index
    %c0_12 = arith.constant 0 : index
    %11 = vector.load %arg7[%c0_11, %c0_12] : memref<1x128xf32, #tpu.memory_space<vmem>>, vector<1x128xf32>
    %12 = vector.broadcast %11 : vector<1x128xf32> to vector<128x128xf32>
    %13 = arith.addf %10, %12 : vector<128x128xf32>
    %cst_13 = arith.constant 0.000000e+00 : f32
    %14 = vector.broadcast %cst_13 : f32 to vector<128x128xf32>
    %15 = arith.maximumf %13, %14 : vector<128x128xf32>
    %16 = vector.shape_cast %7 : vector<256x128xf32> to vector<16x16x128xf32>
    %17 = vector.shape_cast %15 : vector<128x128xf32> to vector<16x8x128xf32>
    %c0_14 = arith.constant 0 : index
    %c0_15 = arith.constant 0 : index
    %c0_16 = arith.constant 0 : index
    %18 = vector.load %arg3[%c0_14, %c0_15, %c0_16] : memref<16x8x16xf32, #tpu.memory_space<vmem>>, vector<16x8x16xf32>
    %cst_17 = arith.constant dense<0.000000e+00> : vector<16x8x128xf32>
    %19 = tpu.matmul %18, %16, %cst_17 {dimension_numbers = #tpu.dot_dimension_numbers<[2], [1], [1], [2], [0, 0, 0, 1, 1, 2], [0], [0]>} : vector<16x8x16xf32>, vector<16x16x128xf32>, vector<16x8x128xf32> -> vector<16x8x128xf32>
    %20 = arith.mulf %19, %17 : vector<16x8x128xf32>
    %cst_18 = arith.constant dense<0.000000e+00> : vector<16x128xf32>
    %21 = vector.multi_reduction <add>, %20, %cst_18 [1] : vector<16x8x128xf32> to vector<16x128xf32>
    %c0_19 = arith.constant 0 : index
    %c0_20 = arith.constant 0 : index
    %22 = vector.load %arg8[%c0_19, %c0_20] : memref<128x128xf32, #tpu.memory_space<vmem>>, vector<128x128xf32>
    %cst_21 = arith.constant dense<0.000000e+00> : vector<16x128xf32>
    %23 = tpu.matmul %21, %22, %cst_21 {dimension_numbers = #tpu.dot_dimension_numbers<[1], [0], [0], [1], [0, 0, 1, 1], [], []>} : vector<16x128xf32>, vector<128x128xf32>, vector<16x128xf32> -> vector<16x128xf32>
    %c0_22 = arith.constant 0 : index
    %c0_23 = arith.constant 0 : index
    %24 = vector.load %arg9[%c0_22, %c0_23] : memref<1x128xf32, #tpu.memory_space<vmem>>, vector<1x128xf32>
    %25 = vector.broadcast %24 : vector<1x128xf32> to vector<16x128xf32>
    %26 = arith.addf %23, %25 : vector<16x128xf32>
    %c0_24 = arith.constant 0 : index
    %c0_25 = arith.constant 0 : index
    %27 = vector.load %arg10[%c0_24, %c0_25] : memref<16x128xf32, #tpu.memory_space<vmem>>, vector<16x128xf32>
    tpu.vector_store %arg10[%c0_24, %c0_25], %26 {strides = array<i32>} : memref<16x128xf32, #tpu.memory_space<vmem>>, vector<16x128xf32>,
    return
  }
  func.func @transform_0(%arg0: i32) -> (i32, i32) {
    %c0_i32 = arith.constant 0 : i32
    %c0_i32_0 = arith.constant 0 : i32
    return %arg0, %c0_i32 : i32, i32
  }
  func.func @transform_1(%arg0: i32) -> (i32, i32) {
    %c0_i32 = arith.constant 0 : i32
    %c0_i32_0 = arith.constant 0 : i32
    return %arg0, %c0_i32 : i32, i32
  }
  func.func @transform_2(%arg0: i32) -> (i32, i32, i32) {
    %c0_i32 = arith.constant 0 : i32
    %c0_i32_0 = arith.constant 0 : i32
    %c0_i32_1 = arith.constant 0 : i32
    return %arg0, %c0_i32, %c0_i32_0 : i32, i32, i32
  }
  func.func @transform_3(%arg0: i32) -> (i32, i32) {
    %c0_i32 = arith.constant 0 : i32
    %c0_i32_0 = arith.constant 0 : i32
    %c0_i32_1 = arith.constant 0 : i32
    return %c0_i32, %c0_i32_0 : i32, i32
  }
  func.func @transform_4(%arg0: i32) -> (i32, i32) {
    %c0_i32 = arith.constant 0 : i32
    %c0_i32_0 = arith.constant 0 : i32
    %c0_i32_1 = arith.constant 0 : i32
    return %c0_i32, %c0_i32_0 : i32, i32
  }
  func.func @transform_5(%arg0: i32) -> (i32, i32) {
    %c0_i32 = arith.constant 0 : i32
    %c0_i32_0 = arith.constant 0 : i32
    %c0_i32_1 = arith.constant 0 : i32
    return %c0_i32, %c0_i32_0 : i32, i32
  }
  func.func @transform_6(%arg0: i32) -> (i32, i32) {
    %c0_i32 = arith.constant 0 : i32
    %c0_i32_0 = arith.constant 0 : i32
    %c0_i32_1 = arith.constant 0 : i32
    return %c0_i32, %c0_i32_0 : i32, i32
  }
  func.func @transform_7(%arg0: i32) -> (i32, i32) {
    %c0_i32 = arith.constant 0 : i32
    %c0_i32_0 = arith.constant 0 : i32
    %c0_i32_1 = arith.constant 0 : i32
    return %c0_i32, %c0_i32_0 : i32, i32
  }
  func.func @transform_8(%arg0: i32) -> (i32, i32) {
    %c0_i32 = arith.constant 0 : i32
    %c0_i32_0 = arith.constant 0 : i32
    %c0_i32_1 = arith.constant 0 : i32
    return %c0_i32, %c0_i32_0 : i32, i32
  }
  func.func @transform_9(%arg0: i32) -> (i32, i32) {
    %c0_i32 = arith.constant 0 : i32
    %c0_i32_0 = arith.constant 0 : i32
    return %arg0, %c0_i32 : i32, i32
  }
}

</mosaic_0001>

<bundles_post_ra>
// kernel: tpu_custom_call.1
= control target key start
LH: loop header
LB: loop body
LE: loop exit
PB: predicated region body
PF: predicated region fallthrough
CT: control target
= control target key end

     0   :  { %14 = vsyncpa [#allocation3], 0  ;;  %s3160_s0 = inlined_call_operand.vmem [shape: bf16[256,32], index: 0, kind: input, shape index: {}]   ;;  %s3161_s1 = inlined_call_operand.vmem [shape: bf16[128,24], index: 1, kind: input, shape index: {}]   ;;  %s3162_s2 = inlined_call_operand.vmem [shape: f32[16,8,16], index: 2, kind: input, shape index: {}]   ;;  %s3163_s3 = inlined_call_operand.hbm [shape: bf16[32,128], index: 3, kind: input, shape index: {}]   ;;  %s3164_s4 = inlined_call_operand.vmem [shape: f32[1,128], index: 4, kind: input, shape index: {}]   ;;  %s3165_s5 = inlined_call_operand.hbm [shape: bf16[24,128], index: 5, kind: input, shape index: {}]   ;;  %s3166_s6 = inlined_call_operand.vmem [shape: f32[1,128], index: 6, kind: input, shape index: {}]   ;;  %s3167_s7 = inlined_call_operand.vmem [shape: f32[128,128], index: 7, kind: input, shape index: {}]   ;;  %s3168_s8 = inlined_call_operand.vmem [shape: f32[1,128], index: 8, kind: input, shape index: {}]   ;;  %s3169_s9 = inlined_call_operand.hbm [shape: f32[16,128], index: 9, kind: output, shape index: {}]  }
   0x1   :  { %15 = vsyncpa [#allocation6], 0 }
   0x2   :  { %16 = vsyncpa [#allocation4], 0  ;;  %s2673_s30 = smov [#allocation2]   ;;  %s2601_s13 = scalar_lea.hbm %s3163_s3, 256 }
   0x3   :  { %s28_s10 = sshll.u32 %s2673_s30, 4  ;;  %p2602_p0 = scmp.ne.s32.totalorder %s3163_s3, %s2601_s13  ;;  %s29_s10 = int_to_ptr.vmem [resolvable:$true] %s28_s10 }
   0x4   :  { %p2605_p1 = scmp.lt.u32.totalorder %s2601_s13, %s3163_s3 }
   0x6   :  { %p2607_p2 = pnand %p2605_p1, %p2602_p0 }
   0x8   :  { %2610 = shalt.err (!%p2607_p2)
}
   0x9   :  { %s2611_s18 = scalar_lea.vmem %s29_s10, 256  ;;  %p2616_p4 = scmp.lt.s32.totalorder %s29_s10, %s29_s10 }
   0xa   :  { %p2612_p3 = scmp.ne.s32.totalorder %s29_s10, %s2611_s18  ;;  %p2617_p5 = scmp.lt.s32.totalorder %s2611_s18, %s2611_s18 }
   0xc   :  { %p2618_p6 = por %p2617_p5, %p2616_p4 }
   0xe   :  { %p2619_p7 = pnand %p2618_p6, %p2612_p3 }
  0x10   :  { %2622 = shalt.err (!%p2619_p7)
}
  0x11   :  { %s2674_s19 = smov 64   ;;  %s2675_s20 = smov 4  }
  0x12   :  { %34 = dma.hbm_to_vmem [thread:$0]  %s3163_s3, 256, %s29_s10, [#allocation3], %s2674_s19, %s2674_s19, %s2675_s20  }
  0x13   :  { %s2676_s23 = smov [#allocation5]   ;;  %s2623_s27 = scalar_lea.hbm %s3165_s5, 192 }
  0x14   :  { %s42_s24 = sshll.u32 %s2676_s23, 4  ;;  %p2624_p8 = scmp.ne.s32.totalorder %s3165_s5, %s2623_s27  ;;  %s43_s24 = int_to_ptr.vmem [resolvable:$true] %s42_s24 }
  0x15   :  { %p2627_p9 = scmp.lt.u32.totalorder %s2623_s27, %s3165_s5 }
  0x17   :  { %p2629_p10 = pnand %p2627_p9, %p2624_p8 }
  0x19   :  { %2632 = shalt.err (!%p2629_p10)
}
  0x1a   :  { %s2633_s12 = scalar_lea.vmem %s43_s24, 192  ;;  %p2638_p12 = scmp.lt.s32.totalorder %s43_s24, %s43_s24 }
  0x1b   :  { %p2634_p11 = scmp.ne.s32.totalorder %s43_s24, %s2633_s12  ;;  %p2639_p13 = scmp.lt.s32.totalorder %s2633_s12, %s2633_s12 }
  0x1d   :  { %p2640_p0 = por %p2639_p13, %p2638_p12 }
  0x1f   :  { %p2641_p1 = pnand %p2640_p0, %p2634_p11 }
  0x21   :  { %2644 = shalt.err (!%p2641_p1)
}
  0x22   :  { %48 = dma.hbm_to_vmem [thread:$0]  %s3165_s5, 192, %s43_s24, [#allocation6], %s2674_s19, %s2674_s19, %s2675_s20  }
  0x23   :  { %2667 = dma.done.wait [#allocation3], 256  }
  0x24   :  { %2668 = vsyncadd [#allocation3], 4294967040 }
  0x25   :  { %2669 = dma.done.wait [#allocation6], 192  }
  0x26   :  { %2670 = vsyncadd [#allocation6], 4294967104  ;;  %v2573_v0 = vld [vmem:[#allocation2] sm:$0xff]   ;;  %v2574_v1 = vld [vmem:[#allocation2 + $0x8] sm:$0xff]   ;;  %vm197_vm0 = vcmask 261120   ;;  %vm539_vm1 = vcmask 1043456  }
  0x27   :  { %2275 = vmatprep.subr.bf16.mxu0 %v2573_v0  ;;  %v2575_v2 = vld [vmem:[%s3160_s0] sm:$0xff]   ;;  %2558 = vmatprep.subr.bf16.mxu1 %v2573_v0  ;;  %v2576_v3 = vld [vmem:[%s3160_s0 + $0x8] sm:$0xff]   ;;  %v2577_v4 = vld [vmem:[%s3160_s0 + $0x10] sm:$0xff]   ;;  %vm514_vm2 = vcmask 195584   ;;  %v2677_v29 = vmov 0.0|0.0   ;;  %vm2678_vm3 = vmmov 0  }
  0x28   :  { %2276 = vmatpush3.bf16.msra.mxu0 %v2573_v0  ;;  %2560 = vmatpush3.bf16.msra.mxu1 %v2573_v0  ;;  %v2578_v5 = vld [vmem:[%s3160_s0 + $0x18] sm:$0xff]   ;;  %v2586_v6 = vld [vmem:[%s3160_s0 + $0x60] sm:$0xff]   ;;  %v2588_v8 = vld [vmem:[%s3160_s0 + $0x68] sm:$0xff]   ;;  %v2679_v30 = vmov 0.0   ;;  %vm672_vm4 = vcmask 130048   ;;  %vm1992_vm5 = vcmask 1041409  }
  0x29   :  { %2277 = vmatprep.subr.bf16.mxu0 %v2574_v1  ;;  %2279 = vmatprep.mubr.msk.bf16.mxu0 %vm197_vm0, %v2575_v2  ;;  %v2579_v7 = vld [vmem:[%s3160_s0 + $0x20] sm:$0xff]   ;;  %v2589_v9 = vld [vmem:[%s3160_s0 + $0x70] sm:$0xff]   ;;  %v2592_v11 = vld [vmem:[#allocation5 + $0x8] ss:$0 sps:$4 sm:$0xff]   ;;  %vm1994_vm6 = vcmask 1042434   ;;  %vm1996_vm7 = vcmask 1043459  }
  0x2a   :  { %2559 = vmatprep.subr.bf16.mxu1 %v2574_v1  ;;  %2303 = vmatprep.mubr.msk.bf16.mxu1 %vm197_vm0, %v2586_v6  ;;  %v2591_v10 = vld [vmem:[#allocation5] sm:$0xff]   ;;  %v2580_v12 = vld [vmem:[%s3160_s0 + $0x28] sm:$0xff]   ;;  %v2590_v13 = vld [vmem:[%s3160_s0 + $0x78] sm:$0xff]   ;;  %v541_v15 = vsel %vm539_vm1, %v2592_v11, 0  ;;  %vm1998_vm8 = vcmask 1044484   ;;  %vm2000_vm9 = vcmask 1045509  }
  0x2b   :  { %v2581_v14 = vld [vmem:[%s3160_s0 + $0x30] sm:$0xff]   ;;  %v2593_v16 = vld [vmem:[%s3161_s1] sm:$0xff]   ;;  %v2594_v17 = vld [vmem:[%s3161_s1 + $0x8] sm:$0xff]   ;;  %vm2002_vm10 = vcmask 1046534   ;;  %vm2004_vm11 = vcmask 1047559   ;;  %s2680_s25 = smov [#allocation7]  }
  0x2c   :  { %2278 = vmatpush3.bf16.msra.mxu0 %v2574_v1  ;;  %2561 = vmatpush3.bf16.msra.mxu1 %v2574_v1  ;;  %v2582_v18 = vld [vmem:[%s3160_s0 + $0x38] sm:$0xff]   ;;  %v2595_v19 = vld [vmem:[%s3161_s1 + $0x10] sm:$0xff]   ;;  %v2583_v20 = vld [vmem:[%s3160_s0 + $0x40] sm:$0xff]   ;;  %s2097_s26 = sshll.u32 %s2680_s25, 4  ;;  %s2098_s26 = int_to_ptr.vmem [resolvable:$true] %s2097_s26 }
  0x2d   :  { %2311 = vmatprep.subr.bf16.mxu1 %v2591_v10  ;;  %v2596_v21 = vld [vmem:[%s3161_s1 + $0x18] sm:$0xff]   ;;  %v2584_v22 = vld [vmem:[%s3160_s0 + $0x48] sm:$0xff]   ;;  %v2597_v23 = vld [vmem:[%s3161_s1 + $0x20] sm:$0xff]   ;;  %2502 = vmatprep.subr.bf16.mxu0 %v2677_v29  ;;  %s2645_s27 = scalar_lea.vmem %s2098_s26, 256  ;;  %p2650_p3 = scmp.lt.s32.totalorder %s2098_s26, %s2098_s26 }
  0x2e   :  { %v2585_v24 = vld [vmem:[%s3160_s0 + $0x50] sm:$0xff]   ;;  %v2598_v25 = vld [vmem:[%s3161_s1 + $0x28] sm:$0xff]   ;;  %v2587_v26 = vld [vmem:[%s3160_s0 + $0x58] sm:$0xff]   ;;  %p2646_p2 = scmp.ne.s32.totalorder %s2098_s26, %s2645_s27  ;;  %p2651_p4 = scmp.lt.s32.totalorder %s2645_s27, %s2645_s27 }
  0x2f   :  { %2280 = vmatmul.mubr.msk.bf16.vlgmr.msra.gmra.mrb[0].mxu0 %vm197_vm0, %v2576_v3  ;;  %2304 = vmatmul.mubr.msk.bf16.vlgmr.msra.gmra.mrb[0].mxu1 %vm197_vm0, %v2588_v8  ;;  %v2599_v27 = vld [vmem:[%s3161_s1 + $0x30] sm:$0xff]   ;;  %v2600_v28 = vld [vmem:[%s3161_s1 + $0x38] sm:$0xff]   ;;  %v2862_v31 = vld [vmem:[%s3164_s4] ss:$0 sm:$0xff] }
  0x30   :  { %2283 = vmatprep.mubr.msk.bf16.mxu0 %vm197_vm0, %v2577_v4  ;;  %2307 = vmatprep.mubr.msk.bf16.mxu1 %vm197_vm0, %v2589_v9  ;;  %v656_v56 = vld [vmem:[%s3162_s2] sm:$0xff]  ;;  %p2652_p5 = por %p2651_p4, %p2650_p3 }
  0x31   :  { %2312 = vmatpush3.bf16.msra.mxu1 %v2591_v10 }
  0x32   :  { %2562 = vmatprep.subr.msk.bf16.mxu1 %vm539_vm1, %v2592_v11  ;;  %p2653_p6 = pnand %p2652_p5, %p2646_p2 }
  0x35   :  { %2314 = vmatpush3.bf16.msra.mxu1 %v541_v15 }
  0x36   :  { %2478 = vmatprep.subr.bf16.mxu1 %v2677_v29 }
  0x37   :  { %2284 = vmatmul.mubr.msk.bf16.gmra.mrb[4].mxu0 %vm197_vm0, %v2578_v5  ;;  %2308 = vmatmul.mubr.msk.bf16.gmra.mrb[4].mxu1 %vm197_vm0, %v2590_v13 }
  0x38   :  { %2287 = vmatprep.mubr.msk.bf16.mxu0 %vm197_vm0, %v2579_v7  ;;  %2315 = vmatprep.mubr.msk.bf16.mxu1 %vm514_vm2, %v2593_v16  ;;  %v657_v7 = vld [vmem:[%s3162_s2 + $0x8] sm:$0xff] }
  0x3f   :  { %2288 = vmatmul.mubr.msk.bf16.gmra.mrb[8].mxu0 %vm197_vm0, %v2580_v12  ;;  %2316 = vmatmul.mubr.msk.bf16.vlgmr.msra.gmra.mrb[8].mxu1 %vm514_vm2, %v2594_v17 }
  0x40   :  { %2291 = vmatprep.mubr.msk.bf16.mxu0 %vm197_vm0, %v2581_v14  ;;  %2319 = vmatprep.mubr.msk.bf16.mxu1 %vm514_vm2, %v2595_v19 }
  0x47   :  { %2292 = vmatmul.mubr.msk.bf16.gmra.mrb[12].mxu0 %vm197_vm0, %v2582_v18  ;;  %2320 = vmatmul.mubr.msk.bf16.gmra.mrb[12].mxu1 %vm514_vm2, %v2596_v21 }
  0x48   :  { %2295 = vmatprep.mubr.msk.bf16.mxu0 %vm197_vm0, %v2583_v20  ;;  %2323 = vmatprep.mubr.msk.bf16.mxu1 %vm514_vm2, %v2597_v23 }
  0x4f   :  { %2296 = vmatmul.mubr.msk.bf16.gmra.mrb[16].mxu0 %vm197_vm0, %v2584_v22  ;;  %2324 = vmatmul.mubr.msk.bf16.gmra.mrb[16].mxu1 %vm514_vm2, %v2598_v25  ;;  %v658_v22 = vld [vmem:[%s3162_s2 + $0x10] sm:$0xff] }
  0x50   :  { %2299 = vmatprep.mubr.msk.bf16.mxu0 %vm197_vm0, %v2585_v24  ;;  %2327 = vmatprep.mubr.msk.bf16.mxu1 %vm514_vm2, %v2599_v27 }
  0x57   :  { %2300 = vmatmul.mubr.msk.bf16.gmra.mrb[20].mxu0 %vm197_vm0, %v2587_v26  ;;  %2328 = vmatmul.mubr.msk.bf16.gmra.mrb[20].mxu1 %vm514_vm2, %v2600_v28 }
  0x58   :  { %2335 = vmatprep.mubr.msk.f32.mxu1 %vm2678_vm3, %v2679_v30  ;;  %2391 = vmatprep.mubr.msk.f32.mxu0 %vm2678_vm3, %v2679_v30 }
 0x102   :  { %v2281_v32 = vpop.f32.mrb[0].mxu0  ;;  %v2305_v45 = vpop.f32.mrb[0].mxu1 }
 0x103   :  { %v289_v33 = vadd.f32 %v2281_v32, %v2862_v31  ;;  %v280_v34 = vpop.f32.mrb[1].mxu0  ;;  %v385_v48 = vadd.f32 %v2305_v45, %v2862_v31  ;;  %v376_v49 = vpop.f32.mrb[1].mxu1 }
 0x104   :  { %v281_v35 = vadd.f32 %v2862_v31, %v280_v34  ;;  %v2282_v36 = vpop.f32.mrb[2].mxu0  ;;  %v377_v52 = vadd.f32 %v2862_v31, %v376_v49  ;;  %v2306_v53 = vpop.f32.mrb[2].mxu1 }
 0x105   :  { %v292_v37 = vadd.f32 %v2282_v36, %v2862_v31  ;;  %v283_v38 = vpop.f32.mrb[3].mxu0  ;;  %v409_v40 = vmax.f32 %v289_v33, 0.0  ;;  %v433_v57 = vmax.f32 %v385_v48, 0.0  ;;  %v388_v58 = vadd.f32 %v2306_v53, %v2862_v31  ;;  %v379_v59 = vpop.f32.mrb[3].mxu1  ;;  %v660_v53 = vld [vmem:[%s3162_s2 + $0x20] sm:$0xff] }
 0x106   :  { %v284_v39 = vadd.f32 %v2862_v31, %v283_v38  ;;  %v407_v42 = vmax.f32 %v281_v35, 0.0  ;;  %v431_v62 = vmax.f32 %v377_v52, 0.0  ;;  %v380_v63 = vadd.f32 %v2862_v31, %v379_v59 }
 0x107   :  { %v410_v41 = vmax.f32 %v292_v37, 0.0  ;;  %v434_v1 = vmax.f32 %v388_v58, 0.0 }
 0x108   :  { %v408_v43 = vmax.f32 %v284_v39, 0.0  ;;  %v432_v4 = vmax.f32 %v380_v63, 0.0 }
 0x109   :  { %v2482_v44 = vpack.c.bf16 %v410_v41, %v409_v40  ;;  %v2886_v8 = vpack.c.bf16 %v434_v1, %v433_v57  ;;  %v659_v40 = vld [vmem:[%s3162_s2 + $0x18] sm:$0xff] }
 0x10a   :  { %v2479_v46 = vpack.c.bf16 %v408_v43, %v407_v42  ;;  %v2285_v47 = vpop.f32.mrb[4].mxu0  ;;  %v2889_v10 = vpack.c.bf16 %v432_v4, %v431_v62  ;;  %v2309_v11 = vpop.f32.mrb[4].mxu1  ;;  %v661_v62 = vld [vmem:[%s3162_s2 + $0x28] sm:$0xff] }
 0x10b   :  { %v305_v50 = vadd.f32 %v2285_v47, %v2862_v31  ;;  %v296_v51 = vpop.f32.mrb[5].mxu0  ;;  %v401_v14 = vadd.f32 %v2309_v11, %v2862_v31  ;;  %v392_v15 = vpop.f32.mrb[5].mxu1  ;;  %v662_v11 = vld [vmem:[%s3162_s2 + $0x30] sm:$0xff] }
 0x10c   :  { %v297_v54 = vadd.f32 %v2862_v31, %v296_v51  ;;  %v2286_v55 = vpop.f32.mrb[6].mxu0  ;;  %2480 = vmatpush3.bf16.msra.mxu1 %v2479_v46  ;;  %v393_v18 = vadd.f32 %v2862_v31, %v392_v15  ;;  %v2310_v19 = vpop.f32.mrb[6].mxu1 }
 0x10d   :  { %v308_v60 = vadd.f32 %v2286_v55, %v2862_v31  ;;  %v299_v61 = vpop.f32.mrb[7].mxu0  ;;  %2481 = vmatprep.subr.bf16.mxu1 %v2677_v29  ;;  %v413_v2 = vmax.f32 %v305_v50, 0.0  ;;  %v437_v23 = vmax.f32 %v401_v14, 0.0  ;;  %v404_v24 = vadd.f32 %v2310_v19, %v2862_v31  ;;  %v395_v25 = vpop.f32.mrb[7].mxu1 }
 0x10e   :  { %v300_v0 = vadd.f32 %v2862_v31, %v299_v61  ;;  %v411_v5 = vmax.f32 %v297_v54, 0.0  ;;  %v435_v28 = vmax.f32 %v393_v18, 0.0  ;;  %v396_v32 = vadd.f32 %v2862_v31, %v395_v25 }
 0x10f   :  { %v414_v3 = vmax.f32 %v308_v60, 0.0  ;;  %2336 = vmatmul.mubr.msk.f32.vlgmr.msra.gmra.mrb[24].mxu1 %vm672_vm4, %v656_v56  ;;  %v438_v34 = vmax.f32 %v404_v24, 0.0 }
 0x110   :  { %v412_v6 = vmax.f32 %v300_v0, 0.0  ;;  %2483 = vmatpush3.bf16.msra.mxu1 %v2482_v44  ;;  %2342 = vmatprep.mubr.msk.f32.mxu1 %vm2678_vm3, %v2679_v30  ;;  %v436_v37 = vmax.f32 %v396_v32, 0.0 }
 0x111   :  { %v2488_v9 = vpack.c.bf16 %v414_v3, %v413_v2  ;;  %2484 = vmatprep.subr.bf16.mxu1 %v2677_v29  ;;  %v2912_v41 = vpack.c.bf16 %v438_v34, %v437_v23  ;;  %v664_v34 = vld [vmem:[%s3162_s2 + $0x40] sm:$0xff] }
 0x112   :  { %v2485_v12 = vpack.c.bf16 %v412_v6, %v411_v5  ;;  %v2289_v13 = vpop.f32.mrb[8].mxu0  ;;  %v2915_v43 = vpack.c.bf16 %v436_v37, %v435_v28  ;;  %v2917_v44 = vpop.f32.mrb[8].mxu1 }
 0x113   :  { %v321_v16 = vadd.f32 %v2289_v13, %v2862_v31  ;;  %v312_v17 = vpop.f32.mrb[9].mxu0  ;;  %2343 = vmatmul.mubr.msk.f32.vlgmr.msra.gmra.mrb[26].mxu1 %vm672_vm4, %v657_v7  ;;  %v2919_v47 = vpop.f32.mrb[9].mxu1 }
 0x114   :  { %v313_v20 = vadd.f32 %v2862_v31, %v312_v17  ;;  %v2290_v21 = vpop.f32.mrb[10].mxu0  ;;  %2486 = vmatpush3.bf16.msra.mxu1 %v2485_v12  ;;  %2349 = vmatprep.mubr.msk.f32.mxu1 %vm2678_vm3, %v2679_v30  ;;  %v2923_v50 = vpop.f32.mrb[10].mxu1 }
 0x115   :  { %v324_v26 = vadd.f32 %v2290_v21, %v2862_v31  ;;  %v315_v27 = vpop.f32.mrb[11].mxu0  ;;  %2487 = vmatprep.subr.bf16.mxu1 %v2677_v29  ;;  %v417_v35 = vmax.f32 %v321_v16, 0.0  ;;  %v2931_v54 = vpop.f32.mrb[11].mxu1 }
 0x116   :  { %v316_v33 = vadd.f32 %v2862_v31, %v315_v27  ;;  %v415_v38 = vmax.f32 %v313_v20, 0.0  ;;  %v663_v20 = vld [vmem:[%s3162_s2 + $0x38] sm:$0xff] }
 0x117   :  { %v418_v36 = vmax.f32 %v324_v26, 0.0  ;;  %2350 = vmatmul.mubr.msk.f32.vlgmr.msra.gmra.mrb[28].mxu1 %vm672_vm4, %v658_v22 }
 0x118   :  { %v416_v39 = vmax.f32 %v316_v33, 0.0  ;;  %2489 = vmatpush3.bf16.msra.mxu1 %v2488_v9  ;;  %2356 = vmatprep.mubr.msk.f32.mxu1 %vm2678_vm3, %v2679_v30 }
 0x119   :  { %v2494_v42 = vpack.c.bf16 %v418_v36, %v417_v35  ;;  %2490 = vmatprep.subr.bf16.mxu1 %v2677_v29  ;;  %v665_v35 = vld [vmem:[%s3162_s2 + $0x48] sm:$0xff] }
 0x11a   :  { %v2491_v45 = vpack.c.bf16 %v416_v39, %v415_v38  ;;  %v2293_v46 = vpop.f32.mrb[12].mxu0  ;;  %v2943_v0 = vpop.f32.mrb[12].mxu1 }
 0x11b   :  { %v337_v48 = vadd.f32 %v2293_v46, %v2862_v31  ;;  %v328_v49 = vpop.f32.mrb[13].mxu0  ;;  %2357 = vmatmul.mubr.msk.f32.vlgmr.msra.gmra.mrb[30].mxu1 %vm672_vm4, %v659_v40  ;;  %v2945_v3 = vpop.f32.mrb[13].mxu1 }
 0x11c   :  { %v329_v51 = vadd.f32 %v2862_v31, %v328_v49  ;;  %v2294_v52 = vpop.f32.mrb[14].mxu0  ;;  %2492 = vmatpush3.bf16.msra.mxu1 %v2491_v45  ;;  %2363 = vmatprep.mubr.msk.f32.mxu1 %vm2678_vm3, %v2679_v30  ;;  %v2949_v6 = vpop.f32.mrb[14].mxu1 }
 0x11d   :  { %v340_v55 = vadd.f32 %v2294_v52, %v2862_v31  ;;  %v331_v56 = vpop.f32.mrb[15].mxu0  ;;  %2493 = vmatprep.subr.bf16.mxu1 %v2677_v29  ;;  %v421_v58 = vmax.f32 %v337_v48, 0.0  ;;  %v2957_v12 = vpop.f32.mrb[15].mxu1  ;;  %v669_v52 = vld [vmem:[%s3162_s2 + $0x68] sm:$0xff] }
 0x11e   :  { %v332_v57 = vadd.f32 %v2862_v31, %v331_v56  ;;  %v419_v60 = vmax.f32 %v329_v51, 0.0  ;;  %v666_v51 = vld [vmem:[%s3162_s2 + $0x50] sm:$0xff]  ;;  %v1953_v56 = vld [vmem:[%s3167_s7] sm:$0xff] }
 0x11f   :  { %v422_v59 = vmax.f32 %v340_v55, 0.0  ;;  %2364 = vmatmul.mubr.msk.f32.vlgmr.msra.gmra.mrb[32].mxu1 %vm672_vm4, %v660_v53  ;;  %v668_v53 = vld [vmem:[%s3162_s2 + $0x60] sm:$0xff] }
 0x120   :  { %v420_v61 = vmax.f32 %v332_v57, 0.0  ;;  %2495 = vmatpush3.bf16.msra.mxu1 %v2494_v42  ;;  %2370 = vmatprep.mubr.msk.f32.mxu1 %vm2678_vm3, %v2679_v30 }
 0x121   :  { %v2500_v63 = vpack.c.bf16 %v422_v59, %v421_v58  ;;  %2496 = vmatprep.subr.bf16.mxu1 %v2677_v29  ;;  %v1955_v58 = vld [vmem:[%s3167_s7 + $0x10] sm:$0xff]  ;;  %v1956_v59 = vld [vmem:[%s3167_s7 + $0x18] sm:$0xff] }
 0x122   :  { %v2497_v1 = vpack.c.bf16 %v420_v61, %v419_v60  ;;  %v2297_v2 = vpop.f32.mrb[16].mxu0  ;;  %v2969_v22 = vpop.f32.mrb[16].mxu1  ;;  %v2530_v60 = vpack.c.bf16 %v1956_v59, %v1955_v58  ;;  %v1957_v61 = vld [vmem:[%s3167_s7 + $0x20] sm:$0xff] }
 0x123   :  { %v353_v4 = vadd.f32 %v2297_v2, %v2862_v31  ;;  %v344_v5 = vpop.f32.mrb[17].mxu0  ;;  %2371 = vmatmul.mubr.msk.f32.vlgmr.msra.gmra.mrb[34].mxu1 %vm672_vm4, %v661_v62  ;;  %v2971_v25 = vpop.f32.mrb[17].mxu1  ;;  %v1958_v62 = vld [vmem:[%s3167_s7 + $0x28] sm:$0xff]  ;;  %v1960_v2 = vld [vmem:[%s3167_s7 + $0x38] sm:$0xff] }
 0x124   :  { %v345_v7 = vadd.f32 %v2862_v31, %v344_v5  ;;  %v2298_v9 = vpop.f32.mrb[18].mxu0  ;;  %2498 = vmatpush3.bf16.msra.mxu1 %v2497_v1  ;;  %2377 = vmatprep.mubr.msk.f32.mxu1 %vm2678_vm3, %v2679_v30  ;;  %v2975_v28 = vpop.f32.mrb[18].mxu1  ;;  %v1959_v1 = vld [vmem:[%s3167_s7 + $0x30] sm:$0xff]  ;;  %v1961_v5 = vld [vmem:[%s3167_s7 + $0x40] sm:$0xff] }
 0x125   :  { %v356_v13 = vadd.f32 %v2298_v9, %v2862_v31  ;;  %v347_v14 = vpop.f32.mrb[19].mxu0  ;;  %2499 = vmatprep.subr.bf16.mxu1 %v2677_v29  ;;  %v425_v16 = vmax.f32 %v353_v4, 0.0  ;;  %v2984_v36 = vpop.f32.mrb[19].mxu1  ;;  %v2538_v4 = vpack.c.bf16 %v1960_v2, %v1959_v1 }
 0x126   :  { %v348_v15 = vadd.f32 %v2862_v31, %v347_v14  ;;  %v423_v18 = vmax.f32 %v345_v7, 0.0  ;;  %v1962_v7 = vld [vmem:[%s3167_s7 + $0x48] sm:$0xff] }
 0x127   :  { %v426_v17 = vmax.f32 %v356_v13, 0.0  ;;  %2378 = vmatmul.mubr.msk.f32.vlgmr.msra.gmra.mrb[36].mxu1 %vm672_vm4, %v662_v11  ;;  %v2542_v9 = vpack.c.bf16 %v1962_v7, %v1961_v5  ;;  %v1963_v11 = vld [vmem:[%s3167_s7 + $0x50] sm:$0xff]  ;;  %v1964_v13 = vld [vmem:[%s3167_s7 + $0x58] sm:$0xff] }
 0x128   :  { %v424_v19 = vmax.f32 %v348_v15, 0.0  ;;  %2501 = vmatpush3.bf16.msra.mxu1 %v2500_v63  ;;  %2384 = vmatprep.mubr.msk.f32.mxu1 %vm2678_vm3, %v2679_v30  ;;  %v2534_v63 = vpack.c.bf16 %v1958_v62, %v1957_v61  ;;  %v2546_v14 = vpack.c.bf16 %v1964_v13, %v1963_v11  ;;  %v1965_v15 = vld [vmem:[%s3167_s7 + $0x60] sm:$0xff] }
 0x129   :  { %v2506_v21 = vpack.c.bf16 %v426_v17, %v425_v16  ;;  %2505 = vmatprep.subr.bf16.mxu1 %v2677_v29  ;;  %v1966_v16 = vld [vmem:[%s3167_s7 + $0x68] sm:$0xff] }
 0x12a   :  { %v2503_v23 = vpack.c.bf16 %v424_v19, %v423_v18  ;;  %v2301_v24 = vpop.f32.mrb[20].mxu0  ;;  %v2550_v17 = vpack.c.bf16 %v1966_v16, %v1965_v15  ;;  %v1967_v18 = vld [vmem:[%s3167_s7 + $0x70] sm:$0xff]  ;;  %v1968_v19 = vld [vmem:[%s3167_s7 + $0x78] sm:$0xff] }
 0x12b   :  { %v369_v26 = vadd.f32 %v2301_v24, %v2862_v31  ;;  %v360_v27 = vpop.f32.mrb[21].mxu0  ;;  %2385 = vmatmul.mubr.msk.f32.vlgmr.msra.gmra.mrb[38].mxu1 %vm672_vm4, %v663_v20  ;;  %v2554_v20 = vpack.c.bf16 %v1968_v19, %v1967_v18 }
 0x12c   :  { %v361_v32 = vadd.f32 %v2862_v31, %v360_v27  ;;  %v2302_v33 = vpop.f32.mrb[22].mxu0  ;;  %2504 = vmatpush3.bf16.msra.mxu0 %v2503_v23  ;;  %2507 = vmatpush3.bf16.msra.mxu1 %v2506_v21  ;;  %v3097_v21 = vld [vmem:[%s3166_s6] ss:$0 sm:$0xff] }
 0x12d   :  { %v372_v37 = vadd.f32 %v2302_v33, %v2862_v31  ;;  %v363_v38 = vpop.f32.mrb[23].mxu0  ;;  %2398 = vmatprep.mubr.msk.f32.mxu1 %vm2678_vm3, %v2679_v30  ;;  %2511 = vmatprep.subr.bf16.mxu1 %v2677_v29  ;;  %v429_v40 = vmax.f32 %v369_v26, 0.0  ;;  %v578_v23 = vadd.f32 %v3097_v21, %v2919_v47  ;;  %v581_v26 = vadd.f32 %v3097_v21, %v2931_v54 }
 0x12e   :  { %v364_v39 = vadd.f32 %v2862_v31, %v363_v38  ;;  %2508 = vmatprep.subr.bf16.mxu0 %v2677_v29  ;;  %v427_v45 = vmax.f32 %v361_v32, 0.0  ;;  %v667_v31 = vld [vmem:[%s3162_s2 + $0x58] sm:$0xff]  ;;  %v589_v47 = vadd.f32 %v2923_v50, %v3097_v21  ;;  %v597_v50 = vadd.f32 %v3097_v21, %v2957_v12 }
 0x12f   :  { %v430_v42 = vmax.f32 %v372_v37, 0.0  ;;  %2392 = vmatmul.mubr.msk.f32.vlgmr.msra.gmra.mrb[24].mxu0 %vm672_vm4, %v664_v34  ;;  %2399 = vmatmul.mubr.msk.f32.vlgmr.msra.gmra.mrb[40].mxu1 %vm672_vm4, %v665_v35  ;;  %v640_v24 = vmax.f32 %v578_v23, 0.0  ;;  %v586_v34 = vadd.f32 %v2917_v44, %v3097_v21  ;;  %v641_v35 = vmax.f32 %v581_v26, 0.0 }
 0x130   :  { %v428_v46 = vmax.f32 %v364_v39, 0.0  ;;  %2412 = vmatprep.mubr.msk.f32.mxu1 %vm2678_vm3, %v2679_v30  ;;  %2405 = vmatprep.mubr.msk.f32.mxu0 %vm2678_vm3, %v2679_v30  ;;  %v594_v44 = vadd.f32 %v3097_v21, %v2945_v3  ;;  %v602_v13 = vadd.f32 %v2943_v0, %v3097_v21 }
 0x131   :  { %v2512_v48 = vpack.c.bf16 %v430_v42, %v429_v40 }
 0x132   :  { %v2509_v49 = vpack.c.bf16 %v428_v46, %v427_v45  ;;  %v642_v45 = vmax.f32 %v586_v34, 0.0  ;;  %v644_v61 = vmax.f32 %v594_v44, 0.0 }
 0x133   :  { %2513 = vmatpush3.bf16.msra.mxu1 %v2512_v48 }
 0x134   :  { %2510 = vmatpush3.bf16.msra.mxu0 %v2509_v49  ;;  %2517 = vmatprep.subr.bf16.mxu1 %v2677_v29 }
 0x135   :  { %2514 = vmatprep.subr.bf16.mxu0 %v2677_v29 }
 0x136   :  { %2413 = vmatmul.mubr.msk.f32.vlgmr.msra.gmra.mrb[42].mxu1 %vm672_vm4, %v667_v31 }
 0x137   :  { %2406 = vmatmul.mubr.msk.f32.vlgmr.msra.gmra.mrb[26].mxu0 %vm672_vm4, %v666_v51  ;;  %2519 = vmatpush3.bf16.msra.mxu1 %v2886_v8  ;;  %v671_v8 = vld [vmem:[%s3162_s2 + $0x78] sm:$0xff] }
 0x138   :  { %2516 = vmatpush3.bf16.msra.mxu0 %v2889_v10  ;;  %2426 = vmatprep.mubr.msk.f32.mxu1 %vm2678_vm3, %v2679_v30  ;;  %v670_v10 = vld [vmem:[%s3162_s2 + $0x70] sm:$0xff] }
 0x139   :  { %2419 = vmatprep.mubr.msk.f32.mxu0 %vm2678_vm3, %v2679_v30  ;;  %2523 = vmatprep.subr.bf16.mxu1 %v2677_v29 }
 0x13a   :  { %2427 = vmatmul.mubr.msk.f32.vlgmr.msra.gmra.mrb[44].mxu1 %vm672_vm4, %v669_v52  ;;  %2520 = vmatprep.subr.bf16.mxu0 %v2677_v29  ;;  %v3038_v29 = vpop.f32.mrb[20].mxu1 }
 0x13b   :  { %2420 = vmatmul.mubr.msk.f32.vlgmr.msra.gmra.mrb[28].mxu0 %vm672_vm4, %v668_v53  ;;  %2525 = vmatpush3.bf16.msra.mxu1 %v2912_v41  ;;  %v3040_v41 = vpop.f32.mrb[21].mxu1  ;;  %v643_v53 = vmax.f32 %v589_v47, 0.0 }
 0x13c   :  { %2522 = vmatpush3.bf16.msra.mxu0 %v2915_v43  ;;  %2440 = vmatprep.mubr.msk.f32.mxu1 %vm2678_vm3, %v2679_v30  ;;  %v3042_v55 = vpop.f32.mrb[22].mxu1 }
 0x13d   :  { %2433 = vmatprep.mubr.msk.f32.mxu0 %vm2678_vm3, %v2679_v30  ;;  %v3044_v43 = vpop.f32.mrb[23].mxu1  ;;  %v1954_v30 = vld [vmem:[%s3167_s7 + $0x8] sm:$0xff] }
 0x13e   :  { %2441 = vmatmul.mubr.msk.f32.vlgmr.msra.gmra.mrb[46].mxu1 %vm672_vm4, %v671_v8  ;;  %v2526_v57 = vpack.c.bf16 %v1954_v30, %v1953_v56 }
 0x13f   :  { %2434 = vmatmul.mubr.msk.f32.vlgmr.msra.gmra.mrb[30].mxu0 %vm672_vm4, %v670_v10 }
 0x140   :  { %2527 = vmatprep.subr.bf16.mxu0 %v2526_v57 }
 0x141   :  { %2529 = vmatpush3.bf16.msra.mxu0 %v2526_v57 }
 0x142   :  { %2531 = vmatprep.subr.bf16.mxu0 %v2530_v60 }
 0x145   :  { %2533 = vmatpush3.bf16.msra.mxu0 %v2530_v60 }
 0x146   :  { %2535 = vmatprep.subr.bf16.mxu0 %v2534_v63 }
 0x149   :  { %2537 = vmatpush3.bf16.msra.mxu0 %v2534_v63 }
 0x14a   :  { %2539 = vmatprep.subr.bf16.mxu0 %v2538_v4 }
 0x14d   :  { %2541 = vmatpush3.bf16.msra.mxu0 %v2538_v4 }
 0x14e   :  { %2543 = vmatprep.subr.bf16.mxu0 %v2542_v9 }
 0x151   :  { %2545 = vmatpush3.bf16.msra.mxu0 %v2542_v9 }
 0x152   :  { %2547 = vmatprep.subr.bf16.mxu0 %v2546_v14 }
 0x155   :  { %2549 = vmatpush3.bf16.msra.mxu0 %v2546_v14  ;;  %v645_v14 = vmax.f32 %v597_v50, 0.0 }
 0x156   :  { %2551 = vmatprep.subr.bf16.mxu0 %v2550_v17 }
 0x159   :  { %2553 = vmatpush3.bf16.msra.mxu0 %v2550_v17 }
 0x15a   :  { %2555 = vmatprep.subr.bf16.mxu0 %v2554_v20 }
 0x15d   :  { %2557 = vmatpush3.bf16.msra.mxu0 %v2554_v20 }
 0x1e2   :  { %v742_v27 = vpop.f32.mrb[24].mxu1 }
 0x1e3   :  { %v1841_v32 = vmul.f32 %v742_v27, %v640_v24  ;;  %v2337_v33 = vpop.f32.mrb[25].mxu1  ;;  %v646_v27 = vmax.f32 %v602_v13, 0.0 }
 0x1e5   :  { %v1857_v37 = vrot.slane %v1841_v32, 4 }
 0x1e6   :  { %v815_v38 = vpop.f32.mrb[26].mxu1 }
 0x1e7   :  { %v1858_v39 = vadd.f32 %v1857_v37, %v1841_v32  ;;  %v1842_v40 = vmul.f32 %v815_v38, %v641_v35  ;;  %v2344_v42 = vpop.f32.mrb[27].mxu1  ;;  %v605_v32 = vadd.f32 %v2949_v6, %v3097_v21 }
 0x1e9   :  { %v1859_v46 = vrot.slane %v1858_v39, 2  ;;  %v1863_v48 = vrot.slane %v1842_v40, 4  ;;  %v647_v47 = vmax.f32 %v605_v32, 0.0 }
 0x1ea   :  { %v888_v49 = vpop.f32.mrb[28].mxu1 }
 0x1eb   :  { %v1860_v54 = vadd.f32 %v1859_v46, %v1858_v39  ;;  %v1864_v31 = vadd.f32 %v1863_v48, %v1842_v40  ;;  %v1843_v51 = vmul.f32 %v888_v49, %v642_v45  ;;  %v2351_v52 = vpop.f32.mrb[29].mxu1  ;;  %v610_v46 = vadd.f32 %v3097_v21, %v2971_v25 }
 0x1ed   :  { %v1865_v8 = vrot.slane %v1864_v31, 2  ;;  %v1869_v10 = vrot.slane %v1843_v51, 4  ;;  %v1861_v56 = vrot.slane %v1860_v54, 1 }
 0x1ee   :  { %v961_v30 = vpop.f32.mrb[30].mxu1 }
 0x1ef   :  { %v1866_v57 = vadd.f32 %v1865_v8, %v1864_v31  ;;  %v1870_v58 = vadd.f32 %v1869_v10, %v1843_v51  ;;  %v1844_v59 = vmul.f32 %v961_v30, %v643_v53  ;;  %v2358_v60 = vpop.f32.mrb[31].mxu1  ;;  %v1862_v2 = vadd.f32 %v1861_v56, %v1860_v54 }
 0x1f0   :  { %v613_v31 = vadd.f32 %v3097_v21, %v2984_v36  ;;  %v648_v56 = vmax.f32 %v610_v46, 0.0 }
 0x1f1   :  { %v1867_v62 = vrot.slane %v1866_v57, 1  ;;  %v1871_v63 = vrot.slane %v1870_v58, 2  ;;  %v1875_v1 = vrot.slane %v1844_v59, 4 }
 0x1f2   :  { %v1034_v4 = vpop.f32.mrb[32].mxu1 }
 0x1f3   :  { %v1868_v5 = vadd.f32 %v1867_v62, %v1866_v57  ;;  %v1872_v3 = vadd.f32 %v1871_v63, %v1870_v58  ;;  %v1876_v7 = vadd.f32 %v1875_v1, %v1844_v59  ;;  %v1845_v9 = vmul.f32 %v1034_v4, %v644_v61  ;;  %v2365_v11 = vpop.f32.mrb[33].mxu1 }
 0x1f4   :  { %v649_v59 = vmax.f32 %v613_v31, 0.0  ;;  %v618_v4 = vadd.f32 %v2969_v22, %v3097_v21 }
 0x1f5   :  { %v1993_v15 = vsel %vm1992_vm5, %v1868_v5, %v1862_v2  ;;  %v1873_v16 = vrot.slane %v1872_v3, 1  ;;  %v1877_v12 = vrot.slane %v1876_v7, 2  ;;  %v1881_v17 = vrot.slane %v1845_v9, 4 }
 0x1f6   :  { %v1107_v18 = vpop.f32.mrb[34].mxu1  ;;  %v621_v5 = vadd.f32 %v2975_v28, %v3097_v21  ;;  %v626_v28 = vadd.f32 %v3097_v21, %v3040_v41  ;;  %v637_v41 = vadd.f32 %v3042_v55, %v3097_v21 }
 0x1f7   :  { %v1874_v19 = vadd.f32 %v1873_v16, %v1872_v3  ;;  %v1878_v20 = vadd.f32 %v1877_v12, %v1876_v7  ;;  %v1882_v23 = vadd.f32 %v1881_v17, %v1845_v9  ;;  %v1846_v24 = vmul.f32 %v1107_v18, %v645_v14  ;;  %v2372_v26 = vpop.f32.mrb[35].mxu1 }
 0x1f8   :  { %v650_v17 = vmax.f32 %v618_v4, 0.0  ;;  %v651_v18 = vmax.f32 %v621_v5, 0.0  ;;  %v655_v55 = vmax.f32 %v637_v41, 0.0 }
 0x1f9   :  { %v1995_v33 = vsel %vm1994_vm6, %v1874_v19, %v1993_v15  ;;  %v1879_v0 = vrot.slane %v1878_v20, 1  ;;  %v1883_v34 = vrot.slane %v1882_v23, 2  ;;  %v1887_v35 = vrot.slane %v1846_v24, 4 }
 0x1fa   :  { %v1180_v37 = vpop.f32.mrb[36].mxu1  ;;  %v629_v19 = vadd.f32 %v3097_v21, %v3044_v43 }
 0x1fb   :  { %v1880_v38 = vadd.f32 %v1879_v0, %v1878_v20  ;;  %v1884_v39 = vadd.f32 %v1883_v34, %v1882_v23  ;;  %v1888_v40 = vadd.f32 %v1887_v35, %v1846_v24  ;;  %v1847_v42 = vmul.f32 %v1180_v37, %v646_v27  ;;  %v2379_v45 = vpop.f32.mrb[37].mxu1 }
 0x1fc   :  { %v634_v34 = vadd.f32 %v3038_v29, %v3097_v21  ;;  %v652_v45 = vmax.f32 %v626_v28, 0.0 }
 0x1fd   :  { %v1885_v48 = vrot.slane %v1884_v39, 1  ;;  %v1889_v49 = vrot.slane %v1888_v40, 2  ;;  %v1893_v54 = vrot.slane %v1847_v42, 4  ;;  %v1997_v6 = vsel %vm1996_vm7, %v1880_v38, %v1995_v33 }
 0x1fe   :  { %v1253_v51 = vpop.f32.mrb[38].mxu1 }
 0x1ff   :  { %v1886_v52 = vadd.f32 %v1885_v48, %v1884_v39  ;;  %v1890_v53 = vadd.f32 %v1889_v49, %v1888_v40  ;;  %v1894_v44 = vadd.f32 %v1893_v54, %v1847_v42  ;;  %v1848_v8 = vmul.f32 %v1253_v51, %v647_v47  ;;  %v2386_v10 = vpop.f32.mrb[39].mxu1 }
 0x200   :  { %v653_v39 = vmax.f32 %v629_v19, 0.0 }
 0x201   :  { %v1891_v30 = vrot.slane %v1890_v53, 1  ;;  %v1895_v57 = vrot.slane %v1894_v44, 2  ;;  %v1899_v58 = vrot.slane %v1848_v8, 4  ;;  %v1999_v25 = vsel %vm1998_vm8, %v1886_v52, %v1997_v6 }
 0x202   :  { %v1326_v60 = vpop.f32.mrb[24].mxu0  ;;  %v1399_v50 = vpop.f32.mrb[40].mxu1 }
 0x203   :  { %v1892_v61 = vadd.f32 %v1891_v30, %v1890_v53  ;;  %v1896_v62 = vadd.f32 %v1895_v57, %v1894_v44  ;;  %v1900_v36 = vadd.f32 %v1899_v58, %v1848_v8  ;;  %v1849_v63 = vmul.f32 %v1326_v60, %v648_v56  ;;  %v2400_v1 = vpop.f32.mrb[41].mxu1  ;;  %v2393_v2 = vpop.f32.mrb[25].mxu0 }
 0x204   :  { %v1850_v3 = vmul.f32 %v1399_v50, %v649_v59  ;;  %v654_v30 = vmax.f32 %v634_v34, 0.0 }
 0x205   :  { %v1897_v7 = vrot.slane %v1896_v62, 1  ;;  %v1901_v9 = vrot.slane %v1900_v36, 2  ;;  %v1905_v11 = vrot.slane %v1849_v63, 4  ;;  %v2001_v13 = vsel %vm2000_vm9, %v1892_v61, %v1999_v25 }
 0x206   :  { %v1911_v14 = vrot.slane %v1850_v3, 4 }
 0x207   :  { %v1898_v15 = vadd.f32 %v1897_v7, %v1896_v62  ;;  %v1902_v16 = vadd.f32 %v1901_v9, %v1900_v36  ;;  %v1906_v12 = vadd.f32 %v1905_v11, %v1849_v63 }
 0x208   :  { %v1912_v22 = vadd.f32 %v1911_v14, %v1850_v3 }
 0x209   :  { %v1903_v20 = vrot.slane %v1902_v16, 1  ;;  %v1907_v23 = vrot.slane %v1906_v12, 2  ;;  %v1545_v24 = vpop.f32.mrb[42].mxu1  ;;  %v2003_v26 = vsel %vm2002_vm10, %v1898_v15, %v2001_v13 }
 0x20a   :  { %v1913_v27 = vrot.slane %v1912_v22, 2  ;;  %v1852_v32 = vmul.f32 %v1545_v24, %v651_v18  ;;  %v1472_v33 = vpop.f32.mrb[26].mxu0  ;;  %v2414_v0 = vpop.f32.mrb[43].mxu1 }
 0x20b   :  { %v1908_v35 = vadd.f32 %v1907_v23, %v1906_v12  ;;  %v1851_v37 = vmul.f32 %v1472_v33, %v650_v17  ;;  %v2407_v43 = vpop.f32.mrb[27].mxu0  ;;  %v1904_v38 = vadd.f32 %v1903_v20, %v1902_v16 }
 0x20c   :  { %v1914_v40 = vadd.f32 %v1913_v27, %v1912_v22  ;;  %v1923_v42 = vrot.slane %v1852_v32, 4 }
 0x20d   :  { %v1909_v47 = vrot.slane %v1908_v35, 1  ;;  %v1917_v46 = vrot.slane %v1851_v37, 4  ;;  %v1691_v48 = vpop.f32.mrb[44].mxu1  ;;  %v2005_v49 = vsel %vm2004_vm11, %v1904_v38, %v2003_v26 }
 0x20e   :  { %v1915_v54 = vrot.slane %v1914_v40, 1  ;;  %v1924_v6 = vadd.f32 %v1923_v42, %v1852_v32  ;;  %v1854_v31 = vmul.f32 %v1691_v48, %v653_v39  ;;  %v1618_v29 = vpop.f32.mrb[28].mxu0  ;;  %2475 = vmatprep.mubr.f32.mxu0 %v2005_v49  ;;  %v2428_v51 = vpop.f32.mrb[45].mxu1 }
 0x20f   :  { %v1910_v52 = vadd.f32 %v1909_v47, %v1908_v35  ;;  %v1918_v53 = vadd.f32 %v1917_v46, %v1851_v37  ;;  %v1853_v44 = vmul.f32 %v1618_v29, %v652_v45  ;;  %v2421_v8 = vpop.f32.mrb[29].mxu0 }
 0x210   :  { %v1916_v21 = vadd.f32 %v1915_v54, %v1914_v40  ;;  %v1925_v10 = vrot.slane %v1924_v6, 2  ;;  %v1935_v56 = vrot.slane %v1854_v31, 4  ;;  %v2180_v40 = vld [vmem:[%s3168_s8] ss:$0 sm:$0xff] }
 0x211   :  { %v1919_v57 = vrot.slane %v1918_v53, 2  ;;  %v1929_v58 = vrot.slane %v1853_v44, 4  ;;  %v1837_v25 = vpop.f32.mrb[46].mxu1 }
 0x212   :  { %v2006_v59 = vsel %vm1992_vm5, %v1916_v21, %v1910_v52  ;;  %v1926_v60 = vadd.f32 %v1925_v10, %v1924_v6  ;;  %v1936_v50 = vadd.f32 %v1935_v56, %v1854_v31  ;;  %v1856_v61 = vmul.f32 %v1837_v25, %v655_v55  ;;  %v1764_v62 = vpop.f32.mrb[30].mxu0  ;;  %v2442_v36 = vpop.f32.mrb[47].mxu1 }
 0x213   :  { %v1920_v63 = vadd.f32 %v1919_v57, %v1918_v53  ;;  %v1930_v1 = vadd.f32 %v1929_v58, %v1853_v44  ;;  %v1855_v2 = vmul.f32 %v1764_v62, %v654_v30  ;;  %v2435_v4 = vpop.f32.mrb[31].mxu0 }
 0x214   :  { %v1927_v5 = vrot.slane %v1926_v60, 1  ;;  %v1937_v3 = vrot.slane %v1936_v50, 2  ;;  %v1947_v7 = vrot.slane %v1856_v61, 4 }
 0x215   :  { %v1921_v9 = vrot.slane %v1920_v63, 1  ;;  %v1931_v11 = vrot.slane %v1930_v1, 2  ;;  %v1941_v13 = vrot.slane %v1855_v2, 4 }
 0x216   :  { %v1938_v14 = vadd.f32 %v1937_v3, %v1936_v50  ;;  %v1948_v15 = vadd.f32 %v1947_v7, %v1856_v61  ;;  %v1928_v18 = vadd.f32 %v1927_v5, %v1926_v60 }
 0x217   :  { %v1922_v16 = vadd.f32 %v1921_v9, %v1920_v63  ;;  %v1932_v12 = vadd.f32 %v1931_v11, %v1930_v1  ;;  %v1942_v17 = vadd.f32 %v1941_v13, %v1855_v2 }
 0x218   :  { %v1939_v19 = vrot.slane %v1938_v14, 1  ;;  %v1949_v22 = vrot.slane %v1948_v15, 2 }
 0x219   :  { %v2007_v28 = vsel %vm1994_vm6, %v1922_v16, %v2006_v59  ;;  %v1933_v20 = vrot.slane %v1932_v12, 1  ;;  %v1943_v23 = vrot.slane %v1942_v17, 2 }
 0x21a   :  { %v1950_v24 = vadd.f32 %v1949_v22, %v1948_v15  ;;  %v2008_v26 = vsel %vm1996_vm7, %v1928_v18, %v2007_v28  ;;  %v1940_v33 = vadd.f32 %v1939_v19, %v1938_v14 }
 0x21b   :  { %v1934_v27 = vadd.f32 %v1933_v20, %v1932_v12  ;;  %v1944_v32 = vadd.f32 %v1943_v23, %v1942_v17 }
 0x21c   :  { %v1951_v0 = vrot.slane %v1950_v24, 1 }
 0x21d   :  { %v1945_v34 = vrot.slane %v1944_v32, 1  ;;  %v2009_v35 = vsel %vm1998_vm8, %v1934_v27, %v2008_v26 }
 0x21e   :  { %v2010_v37 = vsel %vm2000_vm9, %v1940_v33, %v2009_v35  ;;  %v1952_v38 = vadd.f32 %v1951_v0, %v1950_v24 }
 0x21f   :  { %v1946_v43 = vadd.f32 %v1945_v34, %v1944_v32 }
 0x221   :  { %v2011_v41 = vsel %vm2002_vm10, %v1946_v43, %v2010_v37 }
 0x222   :  { %v2012_v39 = vsel %vm2004_vm11, %v1952_v38, %v2011_v41 }
 0x223   :  { %2476 = vmatmul.mubr.f32.vlgmr.msra.gmra.mrb[32].mxu0 %v2012_v39 }
 0x2f6   :  { %v2477_v42 = vpop.f32.mrb[32].mxu0 }
 0x2f7   :  { %v2087_v45 = vadd.f32 %v2477_v42, %v2180_v40  ;;  %v2081_v47 = vpop.f32.mrb[33].mxu0 }
 0x2f8   :  { %v2082_v46 = vadd.f32 %v2180_v40, %v2081_v47 }
 0x2f9   :  { %2091 = vst [vmem:[#allocation7 + $0x8] sm:$0xff] %v2087_v45 }
 0x2fa   :  { %2090 = vst [vmem:[#allocation7] sm:$0xff] %v2082_v46 }
 0x2fb   :  { %2656 = shalt.err (!%p2653_p6)
}
 0x2fc   :  { %s2657_s8 = scalar_lea.hbm %s3169_s9, 256 }
 0x2fd   :  { %p2658_p7 = scmp.ne.s32.totalorder %s3169_s9, %s2657_s8  ;;  %p2661_p8 = scmp.lt.u32.totalorder %s2657_s8, %s3169_s9 }
 0x2ff   :  { %p2663_p9 = pnand %p2661_p8, %p2658_p7 }
 0x301   :  { %2666 = shalt.err (!%p2663_p9)
}
 0x302   :  { %s2681_s10 = smov 128   ;;  %s2682_s13 = smov 8  }
 0x303   :  { %2103 = dma.vmem_to_hbm [thread:$0]  %s2098_s26, 256, %s3169_s9, [#allocation4], %s2681_s10, %s2681_s10, %s2682_s13  }
 0x304   :  { %2671 = dma.done.wait [#allocation4], 256  }
 0x305   :  { %2672 = vsyncadd [#allocation4], 4294967040 }
 0x306   :  { %2107 = vsyncpa [#allocation3], 1 }
 0x307   :  { %2108 = vsyncpa [#allocation6], 1 }
 0x308   :  { %2109 = vsyncpa [#allocation4], 1 }

</bundles_post_ra>
